<compile_context>
chip_gen: v6e
topology: v6e:2x2x1
jax: 0.10.0
libtpu: 0.0.40
codegen_flags: <defaults>
</compile_context>

<pallas_src>
import jax
import jax.numpy as jnp
from jax.experimental import pallas as pl
from jax.experimental.pallas import tpu as pltpu


def _round_up(x, m):
    return ((x + m - 1) // m) * m


def _pick_batch_block(batch, target):
    best = 1
    for d in range(1, min(batch, target) + 1):
        if batch % d == 0:
            best = d
    return best


def make_kernel(n_layers, k_size, mask_fill, halo, pad):
    def kernel(*args):
        x_ref, m_ref = args[0], args[1]
        out_ref, buf_ref = args[-2], args[-1]
        prefs = args[2:-2]

        bb, seq, c_in = x_ref.shape
        c_max = buf_ref.shape[-1]

        # Zero the halo rows once per grid step. Interior rows are always
        # (re)written below, so the zero-halo invariant holds for every layer.
        if halo > 0:
            buf_ref[:, :halo, :] = jnp.zeros((bb, halo, c_max), jnp.float32)
            buf_ref[:, halo + seq:2 * halo + seq, :] = jnp.zeros(
                (bb, halo, c_max), jnp.float32)

        # Stage the (channel-padded) input activations in the scratch interior
        # (sublane-aligned write: halo % 8 == 0, c_in % 128 == 0).
        buf_ref[:, halo:halo + seq, :c_in] = x_ref[...].astype(jnp.float32)

        # Hoisted mask predicate (1.0 => masked position); broadcast over channels.
        masked = m_ref[...] > 0.5                       # (bb, seq, 1)
        fill = jnp.float32(mask_fill)

        for i in range(n_layers):
            w_ref = prefs[2 * i]                        # (K, cin_p, cout_p) bf16, BN folded
            bias = prefs[2 * i + 1][...]                # (1, cout_p) f32, BN folded
            cin = w_ref.shape[1]
            cout = w_ref.shape[2]

            # "same" Conv1d as K per-tap MXU matmuls (bf16 in, f32 accumulate).
            acc = jnp.zeros((bb * seq, cout), jnp.float32)
            for t in range(k_size):
                r0 = halo - pad + t
                win = buf_ref[:, r0:r0 + seq, :cin]                 # (bb, seq, cin) f32
                win = win.reshape(bb * seq, cin).astype(jnp.bfloat16)
                acc = acc + jnp.dot(win, w_ref[t],
                                    preferred_element_type=jnp.float32)

            y = acc.reshape(bb, seq, cout) + bias       # conv bias + eval-mode BN (folded)
            if i != n_layers - 1:
                y = jnp.tanh(y)
            # TODO(synk): torch.dropout is identity here (p=0.0 / eval mode).
            y = jnp.where(masked, fill, y)              # masked_fill after every layer

            if i == n_layers - 1:
                out_ref[...] = y.astype(out_ref.dtype)  # lane-dense (128-padded) store
            else:
                buf_ref[:, halo:halo + seq, :cout] = y  # aligned interior write

    return kernel


def mel_postnet_forward(x, mask, params, *, conv_k_size, mask_fill=0.0,
                        batch_block=8):
    """x: [B, S, in_dim] float32; mask: [B, S] bool (True = masked) or None."""
    B, S, in_dim = x.shape
    n_layers = len(params["conv_w"])
    pad = (conv_k_size - 1) // 2
    halo = _round_up(pad, 8) if pad > 0 else 0

    if mask is None:
        mask = jnp.zeros((B, S), dtype=bool)
    # TODO(synk): the PyTorch docstring allows a per-channel [B, C, S] mask; this
    # kernel implements the per-position [B, S] mask broadcast over channels.

    # Fold eval-mode BatchNorm into the conv weights/bias, zero-pad every channel
    # dim to a multiple of 128 (lane-dense) and cast the weights to bf16.
    w_list, b_list = [], []
    for i in range(n_layers):
        w = params["conv_w"][i] * params["bn_scale"][i][None]        # (K, cin, cout)
        b = params["conv_b"][i] * params["bn_scale"][i] + params["bn_shift"][i]
        cin, cout = w.shape[1], w.shape[2]
        cin_p, cout_p = _round_up(cin, 128), _round_up(cout, 128)
        w = jnp.pad(w, ((0, 0), (0, cin_p - cin), (0, cout_p - cout)))
        b = jnp.pad(b, ((0, 0), (0, cout_p - cout)))
        w_list.append(w.astype(jnp.bfloat16))
        b_list.append(b.astype(jnp.float32))

    c0_p = w_list[0].shape[1]
    cout_final_p = w_list[-1].shape[2]
    c_max = max([c0_p] + [w.shape[2] for w in w_list])

    x_p = jnp.pad(x, ((0, 0), (0, 0), (0, c0_p - in_dim)))
    mask_col = mask.astype(jnp.float32)[..., None]                   # (B, S, 1)

    bb = _pick_batch_block(B, batch_block)
    grid = (B // bb,)

    flat_inputs = [x_p, mask_col]
    in_specs = [
        pl.BlockSpec((bb, S, c0_p), lambda i: (i, 0, 0)),
        pl.BlockSpec((bb, S, 1), lambda i: (i, 0, 0)),
    ]
    for w, b in zip(w_list, b_list):
        flat_inputs += [w, b]
        in_specs += [
            pl.BlockSpec(w.shape, lambda i, nd=w.ndim: (0,) * nd),
            pl.BlockSpec(b.shape, lambda i, nd=b.ndim: (0,) * nd),
        ]

    kernel = make_kernel(n_layers, conv_k_size, mask_fill, halo, pad)
    out = pl.pallas_call(
        kernel,
        out_shape=jax.ShapeDtypeStruct((B, S, cout_final_p), x.dtype),
        grid=grid,
        in_specs=in_specs,
        out_specs=pl.BlockSpec((bb, S, cout_final_p), lambda i: (i, 0, 0)),
        scratch_shapes=[pltpu.VMEM((bb, 2 * halo + S, c_max), jnp.float32)],
        compiler_params=pltpu.CompilerParams(
            dimension_semantics=("parallel",),      # batch blocks are independent
            vmem_limit_bytes=64 * 1024 * 1024),
    )(*flat_inputs)

    return out[..., :in_dim]   # drop the 128-padding on the output channels


def reference(x, mask, params, *, conv_k_size, mask_fill=0.0):
    """Pure-JAX reference mirroring the PyTorch MelPostnet forward (eval, p=0)."""
    pad = (conv_k_size - 1) // 2
    h = x.astype(jnp.float32)
    n_layers = len(params["conv_w"])
    m = None if mask is None else mask[..., None]
    for i in range(n_layers):
        h = jax.lax.conv_general_dilated(
            h, params["conv_w"][i], window_strides=(1,), padding=[(pad, pad)],
            dimension_numbers=("NWC", "WIO", "NWC"))
        h = h + params["conv_b"][i]
        h = h * params["bn_scale"][i] + params["bn_shift"][i]
        if i != n_layers - 1:
            h = jnp.tanh(h)
        if m is not None:
            h = jnp.where(m, mask_fill, h)
    return h


def init_params(key, in_dim, conv_n_layers, conv_k_size, conv_hid_dim):
    """Deterministic synthetic parameters (shapes follow MelPostnet.__init__)."""
    params = {"conv_w": [], "conv_b": [], "bn_scale": [], "bn_shift": []}
    eps = 1e-5
    for i in range(conv_n_layers):
        cin = in_dim if i == 0 else conv_hid_dim
        cout = in_dim if i == conv_n_layers - 1 else conv_hid_dim
        key, k1, k2, k3, k4, k5, k6 = jax.random.split(key, 7)
        # conv weight stored as (K, Cin, Cout)  (== torch weight.transpose(2,1,0))
        params["conv_w"].append(
            0.1 * jax.random.normal(k1, (conv_k_size, cin, cout), jnp.float32))
        params["conv_b"].append(0.1 * jax.random.normal(k2, (1, cout), jnp.float32))
        gamma = 1.0 + 0.1 * jax.random.normal(k3, (1, cout), jnp.float32)
        beta = 0.1 * jax.random.normal(k4, (1, cout), jnp.float32)
        rmean = 0.1 * jax.random.normal(k5, (1, cout), jnp.float32)
        rvar = jnp.abs(jax.random.normal(k6, (1, cout), jnp.float32)) + 0.5
        scale = gamma / jnp.sqrt(rvar + eps)
        params["bn_scale"].append(scale)
        params["bn_shift"].append(beta - rmean * scale)
    return params


if __name__ == "__main__":
    # Small config consistent with the module:
    # in_dim=8, conv_n_layers=3, conv_k_size=3, conv_hid_dim=16, batch=2, seq=16
    B, S = 2, 16
    in_dim, conv_n_layers, conv_k_size, conv_hid_dim = 8, 3, 3, 16
    mask_fill = 0.0

    key = jax.random.PRNGKey(0)
    kx, km, kp = jax.random.split(key, 3)
    x = jax.random.normal(kx, (B, S, in_dim), jnp.float32)
    # mask: True = masked position (matches torch masked_fill semantics)
    mask = jax.random.uniform(km, (B, S)) < 0.25
    params = init_params(kp, in_dim, conv_n_layers, conv_k_size, conv_hid_dim)

    y = mel_postnet_forward(x, mask, params, conv_k_size=conv_k_size,
                            mask_fill=mask_fill)
    y = jax.block_until_ready(y)

    y_ref = reference(x, mask, params, conv_k_size=conv_k_size,
                      mask_fill=mask_fill)
    assert y.shape == (B, S, in_dim), y.shape
    # bf16 MXU operands (f32 accumulation) -> loosened tolerance vs. f32 reference.
    assert jnp.allclose(y, y_ref, rtol=3e-2, atol=3e-2), (
        float(jnp.max(jnp.abs(y - y_ref))))

    print("KERNEL_OK")
</pallas_src>

<mosaic_0001>
module attributes {stable_mosaic.version = 11 : i64} {
  func.func @kernel(%arg0: i32, %arg1: memref<2x16x128xf32, #tpu.memory_space<vmem>>, %arg2: memref<2x16x1xf32, #tpu.memory_space<vmem>>, %arg3: memref<3x128x128xbf16, #tpu.memory_space<vmem>>, %arg4: memref<1x128xf32, #tpu.memory_space<vmem>>, %arg5: memref<3x128x128xbf16, #tpu.memory_space<vmem>>, %arg6: memref<1x128xf32, #tpu.memory_space<vmem>>, %arg7: memref<3x128x128xbf16, #tpu.memory_space<vmem>>, %arg8: memref<1x128xf32, #tpu.memory_space<vmem>>, %arg9: memref<2x16x128xf32, #tpu.memory_space<vmem>>, %arg10: memref<2x32x128xf32, #tpu.memory_space<vmem>>) attributes {dimension_semantics = [#tpu.dimension_semantics<parallel>], iteration_bounds = array<i64: 1>, scalar_prefetch = 0 : i64, scratch_operands = 1 : i64, tpu.core_type = #tpu.core_type<tc>, window_params = [{transform_indices = @transform_0, window_bounds = array<i64: 2, 16, 128>}, {transform_indices = @transform_1, window_bounds = array<i64: 2, 16, 1>}, {pipeline_mode = #tpu.pipeline_mode<synchronous>, transform_indices = @transform_2, window_bounds = array<i64: 3, 128, 128>}, {pipeline_mode = #tpu.pipeline_mode<synchronous>, transform_indices = @transform_3, window_bounds = array<i64: 1, 128>}, {pipeline_mode = #tpu.pipeline_mode<synchronous>, transform_indices = @transform_4, window_bounds = array<i64: 3, 128, 128>}, {pipeline_mode = #tpu.pipeline_mode<synchronous>, transform_indices = @transform_5, window_bounds = array<i64: 1, 128>}, {pipeline_mode = #tpu.pipeline_mode<synchronous>, transform_indices = @transform_6, window_bounds = array<i64: 3, 128, 128>}, {pipeline_mode = #tpu.pipeline_mode<synchronous>, transform_indices = @transform_7, window_bounds = array<i64: 1, 128>}, {transform_indices = @transform_8, window_bounds = array<i64: 2, 16, 128>}]} {
    %cst = arith.constant 0.000000e+00 : f32
    %0 = vector.broadcast %cst : f32 to vector<2x8x128xf32>
    %c0 = arith.constant 0 : index
    %c0_0 = arith.constant 0 : index
    %c0_1 = arith.constant 0 : index
    %1 = vector.load %arg10[%c0, %c0_0, %c0_1] : memref<2x32x128xf32, #tpu.memory_space<vmem>>, vector<2x8x128xf32>
    tpu.vector_store %arg10[%c0, %c0_0, %c0_1], %0 {strides = array<i32>} : memref<2x32x128xf32, #tpu.memory_space<vmem>>, vector<2x8x128xf32>,
    %cst_2 = arith.constant 0.000000e+00 : f32
    %2 = vector.broadcast %cst_2 : f32 to vector<2x8x128xf32>
    %c0_3 = arith.constant 0 : index
    %c24 = arith.constant 24 : index
    %c0_4 = arith.constant 0 : index
    %3 = vector.load %arg10[%c0_3, %c24, %c0_4] : memref<2x32x128xf32, #tpu.memory_space<vmem>>, vector<2x8x128xf32>
    tpu.vector_store %arg10[%c0_3, %c24, %c0_4], %2 {strides = array<i32>} : memref<2x32x128xf32, #tpu.memory_space<vmem>>, vector<2x8x128xf32>,
    %c0_5 = arith.constant 0 : index
    %c0_6 = arith.constant 0 : index
    %c0_7 = arith.constant 0 : index
    %4 = vector.load %arg1[%c0_5, %c0_6, %c0_7] : memref<2x16x128xf32, #tpu.memory_space<vmem>>, vector<2x16x128xf32>
    %c0_8 = arith.constant 0 : index
    %c8 = arith.constant 8 : index
    %c0_9 = arith.constant 0 : index
    %5 = vector.load %arg10[%c0_8, %c8, %c0_9] : memref<2x32x128xf32, #tpu.memory_space<vmem>>, vector<2x16x128xf32>
    tpu.vector_store %arg10[%c0_8, %c8, %c0_9], %4 {strides = array<i32>} : memref<2x32x128xf32, #tpu.memory_space<vmem>>, vector<2x16x128xf32>,
    %c0_10 = arith.constant 0 : index
    %c0_11 = arith.constant 0 : index
    %c0_12 = arith.constant 0 : index
    %6 = vector.load %arg2[%c0_10, %c0_11, %c0_12] : memref<2x16x1xf32, #tpu.memory_space<vmem>>, vector<2x16x1xf32>
    %cst_13 = arith.constant 5.000000e-01 : f32
    %7 = vector.broadcast %cst_13 : f32 to vector<2x16x1xf32>
    %8 = arith.cmpf ogt, %6, %7 : vector<2x16x1xf32>
    %c0_14 = arith.constant 0 : index
    %c0_15 = arith.constant 0 : index
    %9 = vector.load %arg4[%c0_14, %c0_15] : memref<1x128xf32, #tpu.memory_space<vmem>>, vector<1x128xf32>
    %cst_16 = arith.constant 0.000000e+00 : f32
    %10 = vector.broadcast %cst_16 : f32 to vector<32x128xf32>
    %c0_17 = arith.constant 0 : index
    %c7 = arith.constant 7 : index
    %c0_18 = arith.constant 0 : index
    %11 = vector.load %arg10[%c0_17, %c7, %c0_18] : memref<2x32x128xf32, #tpu.memory_space<vmem>>, vector<2x16x128xf32>
    %12 = vector.shape_cast %11 : vector<2x16x128xf32> to vector<32x128xf32>
    %13 = arith.truncf %12 : vector<32x128xf32> to vector<32x128xbf16>
    %c0_19 = arith.constant 0 : index
    %c0_20 = arith.constant 0 : index
    %c0_21 = arith.constant 0 : index
    %14 = vector.load %arg3[%c0_19, %c0_20, %c0_21] : memref<3x128x128xbf16, #tpu.memory_space<vmem>>, vector<1x128x128xbf16>
    %15 = vector.shape_cast %14 : vector<1x128x128xbf16> to vector<128x128xbf16>
    %cst_22 = arith.constant dense<0.000000e+00> : vector<32x128xf32>
    %16 = tpu.matmul %13, %15, %cst_22 {dimension_numbers = #tpu.dot_dimension_numbers<[1], [0], [0], [1], [0, 0, 1, 1], [], []>} : vector<32x128xbf16>, vector<128x128xbf16>, vector<32x128xf32> -> vector<32x128xf32>
    %17 = arith.addf %10, %16 : vector<32x128xf32>
    %c0_23 = arith.constant 0 : index
    %c8_24 = arith.constant 8 : index
    %c0_25 = arith.constant 0 : index
    %18 = vector.load %arg10[%c0_23, %c8_24, %c0_25] : memref<2x32x128xf32, #tpu.memory_space<vmem>>, vector<2x16x128xf32>
    %19 = vector.shape_cast %18 : vector<2x16x128xf32> to vector<32x128xf32>
    %20 = arith.truncf %19 : vector<32x128xf32> to vector<32x128xbf16>
    %c1 = arith.constant 1 : index
    %c0_26 = arith.constant 0 : index
    %c0_27 = arith.constant 0 : index
    %21 = vector.load %arg3[%c1, %c0_26, %c0_27] : memref<3x128x128xbf16, #tpu.memory_space<vmem>>, vector<1x128x128xbf16>
    %22 = vector.shape_cast %21 : vector<1x128x128xbf16> to vector<128x128xbf16>
    %cst_28 = arith.constant dense<0.000000e+00> : vector<32x128xf32>
    %23 = tpu.matmul %20, %22, %cst_28 {dimension_numbers = #tpu.dot_dimension_numbers<[1], [0], [0], [1], [0, 0, 1, 1], [], []>} : vector<32x128xbf16>, vector<128x128xbf16>, vector<32x128xf32> -> vector<32x128xf32>
    %24 = arith.addf %17, %23 : vector<32x128xf32>
    %c0_29 = arith.constant 0 : index
    %c9 = arith.constant 9 : index
    %c0_30 = arith.constant 0 : index
    %25 = vector.load %arg10[%c0_29, %c9, %c0_30] : memref<2x32x128xf32, #tpu.memory_space<vmem>>, vector<2x16x128xf32>
    %26 = vector.shape_cast %25 : vector<2x16x128xf32> to vector<32x128xf32>
    %27 = arith.truncf %26 : vector<32x128xf32> to vector<32x128xbf16>
    %c2 = arith.constant 2 : index
    %c0_31 = arith.constant 0 : index
    %c0_32 = arith.constant 0 : index
    %28 = vector.load %arg3[%c2, %c0_31, %c0_32] : memref<3x128x128xbf16, #tpu.memory_space<vmem>>, vector<1x128x128xbf16>
    %29 = vector.shape_cast %28 : vector<1x128x128xbf16> to vector<128x128xbf16>
    %cst_33 = arith.constant dense<0.000000e+00> : vector<32x128xf32>
    %30 = tpu.matmul %27, %29, %cst_33 {dimension_numbers = #tpu.dot_dimension_numbers<[1], [0], [0], [1], [0, 0, 1, 1], [], []>} : vector<32x128xbf16>, vector<128x128xbf16>, vector<32x128xf32> -> vector<32x128xf32>
    %31 = arith.addf %24, %30 : vector<32x128xf32>
    %32 = vector.shape_cast %31 : vector<32x128xf32> to vector<2x16x128xf32>
    %33 = vector.shape_cast %9 : vector<1x128xf32> to vector<1x1x128xf32>
    %34 = vector.broadcast %33 : vector<1x1x128xf32> to vector<2x16x128xf32>
    %35 = arith.addf %32, %34 : vector<2x16x128xf32>
    %36 = math.tanh %35 : vector<2x16x128xf32>
    %cst_34 = arith.constant 0.000000e+00 : f32
    %37 = vector.shape_cast %8 : vector<2x16x1xi1> to vector<2x16x1xi1>
    %38 = vector.broadcast %37 : vector<2x16x1xi1> to vector<2x16x128xi1>
    %39 = vector.broadcast %cst_34 : f32 to vector<2x16x128xf32>
    %40 = arith.select %38, %39, %36 : vector<2x16x128xi1>, vector<2x16x128xf32>
    %c0_35 = arith.constant 0 : index
    %c8_36 = arith.constant 8 : index
    %c0_37 = arith.constant 0 : index
    %41 = vector.load %arg10[%c0_35, %c8_36, %c0_37] : memref<2x32x128xf32, #tpu.memory_space<vmem>>, vector<2x16x128xf32>
    tpu.vector_store %arg10[%c0_35, %c8_36, %c0_37], %40 {strides = array<i32>} : memref<2x32x128xf32, #tpu.memory_space<vmem>>, vector<2x16x128xf32>,
    %c0_38 = arith.constant 0 : index
    %c0_39 = arith.constant 0 : index
    %42 = vector.load %arg6[%c0_38, %c0_39] : memref<1x128xf32, #tpu.memory_space<vmem>>, vector<1x128xf32>
    %cst_40 = arith.constant 0.000000e+00 : f32
    %43 = vector.broadcast %cst_40 : f32 to vector<32x128xf32>
    %c0_41 = arith.constant 0 : index
    %c7_42 = arith.constant 7 : index
    %c0_43 = arith.constant 0 : index
    %44 = vector.load %arg10[%c0_41, %c7_42, %c0_43] : memref<2x32x128xf32, #tpu.memory_space<vmem>>, vector<2x16x128xf32>
    %45 = vector.shape_cast %44 : vector<2x16x128xf32> to vector<32x128xf32>
    %46 = arith.truncf %45 : vector<32x128xf32> to vector<32x128xbf16>
    %c0_44 = arith.constant 0 : index
    %c0_45 = arith.constant 0 : index
    %c0_46 = arith.constant 0 : index
    %47 = vector.load %arg5[%c0_44, %c0_45, %c0_46] : memref<3x128x128xbf16, #tpu.memory_space<vmem>>, vector<1x128x128xbf16>
    %48 = vector.shape_cast %47 : vector<1x128x128xbf16> to vector<128x128xbf16>
    %cst_47 = arith.constant dense<0.000000e+00> : vector<32x128xf32>
    %49 = tpu.matmul %46, %48, %cst_47 {dimension_numbers = #tpu.dot_dimension_numbers<[1], [0], [0], [1], [0, 0, 1, 1], [], []>} : vector<32x128xbf16>, vector<128x128xbf16>, vector<32x128xf32> -> vector<32x128xf32>
    %50 = arith.addf %43, %49 : vector<32x128xf32>
    %c0_48 = arith.constant 0 : index
    %c8_49 = arith.constant 8 : index
    %c0_50 = arith.constant 0 : index
    %51 = vector.load %arg10[%c0_48, %c8_49, %c0_50] : memref<2x32x128xf32, #tpu.memory_space<vmem>>, vector<2x16x128xf32>
    %52 = vector.shape_cast %51 : vector<2x16x128xf32> to vector<32x128xf32>
    %53 = arith.truncf %52 : vector<32x128xf32> to vector<32x128xbf16>
    %c1_51 = arith.constant 1 : index
    %c0_52 = arith.constant 0 : index
    %c0_53 = arith.constant 0 : index
    %54 = vector.load %arg5[%c1_51, %c0_52, %c0_53] : memref<3x128x128xbf16, #tpu.memory_space<vmem>>, vector<1x128x128xbf16>
    %55 = vector.shape_cast %54 : vector<1x128x128xbf16> to vector<128x128xbf16>
    %cst_54 = arith.constant dense<0.000000e+00> : vector<32x128xf32>
    %56 = tpu.matmul %53, %55, %cst_54 {dimension_numbers = #tpu.dot_dimension_numbers<[1], [0], [0], [1], [0, 0, 1, 1], [], []>} : vector<32x128xbf16>, vector<128x128xbf16>, vector<32x128xf32> -> vector<32x128xf32>
    %57 = arith.addf %50, %56 : vector<32x128xf32>
    %c0_55 = arith.constant 0 : index
    %c9_56 = arith.constant 9 : index
    %c0_57 = arith.constant 0 : index
    %58 = vector.load %arg10[%c0_55, %c9_56, %c0_57] : memref<2x32x128xf32, #tpu.memory_space<vmem>>, vector<2x16x128xf32>
    %59 = vector.shape_cast %58 : vector<2x16x128xf32> to vector<32x128xf32>
    %60 = arith.truncf %59 : vector<32x128xf32> to vector<32x128xbf16>
    %c2_58 = arith.constant 2 : index
    %c0_59 = arith.constant 0 : index
    %c0_60 = arith.constant 0 : index
    %61 = vector.load %arg5[%c2_58, %c0_59, %c0_60] : memref<3x128x128xbf16, #tpu.memory_space<vmem>>, vector<1x128x128xbf16>
    %62 = vector.shape_cast %61 : vector<1x128x128xbf16> to vector<128x128xbf16>
    %cst_61 = arith.constant dense<0.000000e+00> : vector<32x128xf32>
    %63 = tpu.matmul %60, %62, %cst_61 {dimension_numbers = #tpu.dot_dimension_numbers<[1], [0], [0], [1], [0, 0, 1, 1], [], []>} : vector<32x128xbf16>, vector<128x128xbf16>, vector<32x128xf32> -> vector<32x128xf32>
    %64 = arith.addf %57, %63 : vector<32x128xf32>
    %65 = vector.shape_cast %64 : vector<32x128xf32> to vector<2x16x128xf32>
    %66 = vector.shape_cast %42 : vector<1x128xf32> to vector<1x1x128xf32>
    %67 = vector.broadcast %66 : vector<1x1x128xf32> to vector<2x16x128xf32>
    %68 = arith.addf %65, %67 : vector<2x16x128xf32>
    %69 = math.tanh %68 : vector<2x16x128xf32>
    %cst_62 = arith.constant 0.000000e+00 : f32
    %70 = vector.shape_cast %8 : vector<2x16x1xi1> to vector<2x16x1xi1>
    %71 = vector.broadcast %70 : vector<2x16x1xi1> to vector<2x16x128xi1>
    %72 = vector.broadcast %cst_62 : f32 to vector<2x16x128xf32>
    %73 = arith.select %71, %72, %69 : vector<2x16x128xi1>, vector<2x16x128xf32>
    %c0_63 = arith.constant 0 : index
    %c8_64 = arith.constant 8 : index
    %c0_65 = arith.constant 0 : index
    %74 = vector.load %arg10[%c0_63, %c8_64, %c0_65] : memref<2x32x128xf32, #tpu.memory_space<vmem>>, vector<2x16x128xf32>
    tpu.vector_store %arg10[%c0_63, %c8_64, %c0_65], %73 {strides = array<i32>} : memref<2x32x128xf32, #tpu.memory_space<vmem>>, vector<2x16x128xf32>,
    %c0_66 = arith.constant 0 : index
    %c0_67 = arith.constant 0 : index
    %75 = vector.load %arg8[%c0_66, %c0_67] : memref<1x128xf32, #tpu.memory_space<vmem>>, vector<1x128xf32>
    %cst_68 = arith.constant 0.000000e+00 : f32
    %76 = vector.broadcast %cst_68 : f32 to vector<32x128xf32>
    %c0_69 = arith.constant 0 : index
    %c7_70 = arith.constant 7 : index
    %c0_71 = arith.constant 0 : index
    %77 = vector.load %arg10[%c0_69, %c7_70, %c0_71] : memref<2x32x128xf32, #tpu.memory_space<vmem>>, vector<2x16x128xf32>
    %78 = vector.shape_cast %77 : vector<2x16x128xf32> to vector<32x128xf32>
    %79 = arith.truncf %78 : vector<32x128xf32> to vector<32x128xbf16>
    %c0_72 = arith.constant 0 : index
    %c0_73 = arith.constant 0 : index
    %c0_74 = arith.constant 0 : index
    %80 = vector.load %arg7[%c0_72, %c0_73, %c0_74] : memref<3x128x128xbf16, #tpu.memory_space<vmem>>, vector<1x128x128xbf16>
    %81 = vector.shape_cast %80 : vector<1x128x128xbf16> to vector<128x128xbf16>
    %cst_75 = arith.constant dense<0.000000e+00> : vector<32x128xf32>
    %82 = tpu.matmul %79, %81, %cst_75 {dimension_numbers = #tpu.dot_dimension_numbers<[1], [0], [0], [1], [0, 0, 1, 1], [], []>} : vector<32x128xbf16>, vector<128x128xbf16>, vector<32x128xf32> -> vector<32x128xf32>
    %83 = arith.addf %76, %82 : vector<32x128xf32>
    %c0_76 = arith.constant 0 : index
    %c8_77 = arith.constant 8 : index
    %c0_78 = arith.constant 0 : index
    %84 = vector.load %arg10[%c0_76, %c8_77, %c0_78] : memref<2x32x128xf32, #tpu.memory_space<vmem>>, vector<2x16x128xf32>
    %85 = vector.shape_cast %84 : vector<2x16x128xf32> to vector<32x128xf32>
    %86 = arith.truncf %85 : vector<32x128xf32> to vector<32x128xbf16>
    %c1_79 = arith.constant 1 : index
    %c0_80 = arith.constant 0 : index
    %c0_81 = arith.constant 0 : index
    %87 = vector.load %arg7[%c1_79, %c0_80, %c0_81] : memref<3x128x128xbf16, #tpu.memory_space<vmem>>, vector<1x128x128xbf16>
    %88 = vector.shape_cast %87 : vector<1x128x128xbf16> to vector<128x128xbf16>
    %cst_82 = arith.constant dense<0.000000e+00> : vector<32x128xf32>
    %89 = tpu.matmul %86, %88, %cst_82 {dimension_numbers = #tpu.dot_dimension_numbers<[1], [0], [0], [1], [0, 0, 1, 1], [], []>} : vector<32x128xbf16>, vector<128x128xbf16>, vector<32x128xf32> -> vector<32x128xf32>
    %90 = arith.addf %83, %89 : vector<32x128xf32>
    %c0_83 = arith.constant 0 : index
    %c9_84 = arith.constant 9 : index
    %c0_85 = arith.constant 0 : index
    %91 = vector.load %arg10[%c0_83, %c9_84, %c0_85] : memref<2x32x128xf32, #tpu.memory_space<vmem>>, vector<2x16x128xf32>
    %92 = vector.shape_cast %91 : vector<2x16x128xf32> to vector<32x128xf32>
    %93 = arith.truncf %92 : vector<32x128xf32> to vector<32x128xbf16>
    %c2_86 = arith.constant 2 : index
    %c0_87 = arith.constant 0 : index
    %c0_88 = arith.constant 0 : index
    %94 = vector.load %arg7[%c2_86, %c0_87, %c0_88] : memref<3x128x128xbf16, #tpu.memory_space<vmem>>, vector<1x128x128xbf16>
    %95 = vector.shape_cast %94 : vector<1x128x128xbf16> to vector<128x128xbf16>
    %cst_89 = arith.constant dense<0.000000e+00> : vector<32x128xf32>
    %96 = tpu.matmul %93, %95, %cst_89 {dimension_numbers = #tpu.dot_dimension_numbers<[1], [0], [0], [1], [0, 0, 1, 1], [], []>} : vector<32x128xbf16>, vector<128x128xbf16>, vector<32x128xf32> -> vector<32x128xf32>
    %97 = arith.addf %90, %96 : vector<32x128xf32>
    %98 = vector.shape_cast %97 : vector<32x128xf32> to vector<2x16x128xf32>
    %99 = vector.shape_cast %75 : vector<1x128xf32> to vector<1x1x128xf32>
    %100 = vector.broadcast %99 : vector<1x1x128xf32> to vector<2x16x128xf32>
    %101 = arith.addf %98, %100 : vector<2x16x128xf32>
    %cst_90 = arith.constant 0.000000e+00 : f32
    %102 = vector.shape_cast %8 : vector<2x16x1xi1> to vector<2x16x1xi1>
    %103 = vector.broadcast %102 : vector<2x16x1xi1> to vector<2x16x128xi1>
    %104 = vector.broadcast %cst_90 : f32 to vector<2x16x128xf32>
    %105 = arith.select %103, %104, %101 : vector<2x16x128xi1>, vector<2x16x128xf32>
    %c0_91 = arith.constant 0 : index
    %c0_92 = arith.constant 0 : index
    %c0_93 = arith.constant 0 : index
    %106 = vector.load %arg9[%c0_91, %c0_92, %c0_93] : memref<2x16x128xf32, #tpu.memory_space<vmem>>, vector<2x16x128xf32>
    tpu.vector_store %arg9[%c0_91, %c0_92, %c0_93], %105 {strides = array<i32>} : memref<2x16x128xf32, #tpu.memory_space<vmem>>, vector<2x16x128xf32>,
    return
  }
  func.func @transform_0(%arg0: i32) -> (i32, i32, i32) {
    %c0_i32 = arith.constant 0 : i32
    %c0_i32_0 = arith.constant 0 : i32
    %c0_i32_1 = arith.constant 0 : i32
    return %arg0, %c0_i32, %c0_i32_0 : i32, i32, i32
  }
  func.func @transform_1(%arg0: i32) -> (i32, i32, i32) {
    %c0_i32 = arith.constant 0 : i32
    %c0_i32_0 = arith.constant 0 : i32
    %c0_i32_1 = arith.constant 0 : i32
    return %arg0, %c0_i32, %c0_i32_0 : i32, i32, i32
  }
  func.func @transform_2(%arg0: i32) -> (i32, i32, i32) {
    %c0_i32 = arith.constant 0 : i32
    %c0_i32_0 = arith.constant 0 : i32
    %c0_i32_1 = arith.constant 0 : i32
    %c0_i32_2 = arith.constant 0 : i32
    return %c0_i32, %c0_i32_0, %c0_i32_1 : i32, i32, i32
  }
  func.func @transform_3(%arg0: i32) -> (i32, i32) {
    %c0_i32 = arith.constant 0 : i32
    %c0_i32_0 = arith.constant 0 : i32
    %c0_i32_1 = arith.constant 0 : i32
    return %c0_i32, %c0_i32_0 : i32, i32
  }
  func.func @transform_4(%arg0: i32) -> (i32, i32, i32) {
    %c0_i32 = arith.constant 0 : i32
    %c0_i32_0 = arith.constant 0 : i32
    %c0_i32_1 = arith.constant 0 : i32
    %c0_i32_2 = arith.constant 0 : i32
    return %c0_i32, %c0_i32_0, %c0_i32_1 : i32, i32, i32
  }
  func.func @transform_5(%arg0: i32) -> (i32, i32) {
    %c0_i32 = arith.constant 0 : i32
    %c0_i32_0 = arith.constant 0 : i32
    %c0_i32_1 = arith.constant 0 : i32
    return %c0_i32, %c0_i32_0 : i32, i32
  }
  func.func @transform_6(%arg0: i32) -> (i32, i32, i32) {
    %c0_i32 = arith.constant 0 : i32
    %c0_i32_0 = arith.constant 0 : i32
    %c0_i32_1 = arith.constant 0 : i32
    %c0_i32_2 = arith.constant 0 : i32
    return %c0_i32, %c0_i32_0, %c0_i32_1 : i32, i32, i32
  }
  func.func @transform_7(%arg0: i32) -> (i32, i32) {
    %c0_i32 = arith.constant 0 : i32
    %c0_i32_0 = arith.constant 0 : i32
    %c0_i32_1 = arith.constant 0 : i32
    return %c0_i32, %c0_i32_0 : i32, i32
  }
  func.func @transform_8(%arg0: i32) -> (i32, i32, i32) {
    %c0_i32 = arith.constant 0 : i32
    %c0_i32_0 = arith.constant 0 : i32
    %c0_i32_1 = arith.constant 0 : i32
    return %arg0, %c0_i32, %c0_i32_0 : i32, i32, i32
  }
}

</mosaic_0001>

<bundles_post_ra>
// kernel: tpu_custom_call.1
= control target key start
LH: loop header
LB: loop body
LE: loop exit
PB: predicated region body
PF: predicated region fallthrough
CT: control target
= control target key end

     0   :  { %13 = vsyncpa [#allocation4], 0  ;;  %s2033_s0 = inlined_call_operand.vmem [shape: f32[2,16,128], index: 0, kind: input, shape index: {}]   ;;  %s2034_s1 = inlined_call_operand.vmem [shape: f32[2,16,1], index: 1, kind: input, shape index: {}]   ;;  %s2035_s2 = inlined_call_operand.hbm [shape: bf16[3,128,128], index: 2, kind: input, shape index: {}]   ;;  %s2036_s3 = inlined_call_operand.vmem [shape: f32[1,128], index: 3, kind: input, shape index: {}]   ;;  %s2037_s4 = inlined_call_operand.hbm [shape: bf16[3,128,128], index: 4, kind: input, shape index: {}]   ;;  %s2038_s5 = inlined_call_operand.vmem [shape: f32[1,128], index: 5, kind: input, shape index: {}]   ;;  %s2039_s6 = inlined_call_operand.hbm [shape: bf16[3,128,128], index: 6, kind: input, shape index: {}]   ;;  %s2040_s7 = inlined_call_operand.vmem [shape: f32[1,128], index: 7, kind: input, shape index: {}]   ;;  %s2041_s8 = inlined_call_operand.hbm [shape: f32[2,16,128], index: 8, kind: output, shape index: {}]  }
   0x1   :  { %14 = vsyncpa [#allocation7], 0 }
   0x2   :  { %15 = vsyncpa [#allocation5], 0  ;;  %s1835_s27 = smov [#allocation6]   ;;  %s1836_s29 = smov [#allocation3]  }
   0x3   :  { %s39_s28 = sshll.u32 %s1835_s27, 4  ;;  %s25_s30 = sshll.u32 %s1836_s29, 4  ;;  %s40_s28 = int_to_ptr.vmem [resolvable:$true] %s39_s28  ;;  %s26_s30 = int_to_ptr.vmem [resolvable:$true] %s25_s30 }
   0x4   :  { %s1757_s9 = scalar_lea.vmem %s40_s28, 3072  ;;  %p1762_p1 = scmp.lt.s32.totalorder %s40_s28, %s40_s28 }
   0x5   :  { %p1758_p0 = scmp.ne.s32.totalorder %s40_s28, %s1757_s9  ;;  %p1763_p2 = scmp.lt.s32.totalorder %s1757_s9, %s1757_s9 }
   0x7   :  { %p1764_p3 = por %p1763_p2, %p1762_p1 }
   0x9   :  { %p1765_p4 = pnand %p1764_p3, %p1758_p0 }
   0xb   :  { %1768 = shalt.err (!%p1765_p4)
}
   0xc   :  { %s1837_s10 = smov 64   ;;  %s1838_s11 = smov 4  }
   0xd   :  { %45 = dma.hbm_to_vmem [thread:$0]  %s2037_s4, 3072, %s40_s28, [#allocation7], %s1837_s10, %s1837_s10, %s1838_s11  }
   0xe   :  { %s1777_s14 = scalar_lea.vmem %s26_s30, 3072  ;;  %p1782_p6 = scmp.lt.s32.totalorder %s26_s30, %s26_s30 }
   0xf   :  { %p1778_p5 = scmp.ne.s32.totalorder %s26_s30, %s1777_s14  ;;  %p1783_p7 = scmp.lt.s32.totalorder %s1777_s14, %s1777_s14 }
  0x11   :  { %p1784_p8 = por %p1783_p7, %p1782_p6 }
  0x13   :  { %p1785_p9 = pnand %p1784_p8, %p1778_p5 }
  0x15   :  { %1788 = shalt.err (!%p1785_p9)
}
  0x16   :  { %31 = dma.hbm_to_vmem [thread:$0]  %s2035_s2, 3072, %s26_s30, [#allocation4], %s1837_s10, %s1837_s10, %s1838_s11  }
  0x17   :  { %s1839_s17 = smov [#allocation8]  }
  0x18   :  { %s53_s18 = sshll.u32 %s1839_s17, 4  ;;  %s54_s18 = int_to_ptr.vmem [resolvable:$true] %s53_s18 }
  0x19   :  { %s1797_s19 = scalar_lea.vmem %s54_s18, 3072  ;;  %p1802_p11 = scmp.lt.s32.totalorder %s54_s18, %s54_s18 }
  0x1a   :  { %p1798_p10 = scmp.ne.s32.totalorder %s54_s18, %s1797_s19  ;;  %p1803_p12 = scmp.lt.s32.totalorder %s1797_s19, %s1797_s19 }
  0x1c   :  { %p1804_p13 = por %p1803_p12, %p1802_p11 }
  0x1e   :  { %p1805_p0 = pnand %p1804_p13, %p1798_p10 }
  0x20   :  { %1808 = shalt.err (!%p1805_p0)
}
  0x21   :  { %59 = dma.hbm_to_vmem [thread:$0]  %s2039_s6, 3072, %s54_s18, [#allocation7], %s1837_s10, %s1837_s10, %s1838_s11  }
  0x22   :  { %1829 = dma.done.wait [#allocation4], 3072  }
  0x23   :  { %1830 = vsyncadd [#allocation4], 4294964224 }
  0x24   :  { %1831 = dma.done.wait [#allocation7], 6144  }
  0x25   :  { %1832 = vsyncadd [#allocation7], 4294961152  ;;  %v1840_v0 = vmov 0.0   ;;  %v1841_v1 = vmov 0   ;;  %v1641_v2 = vld [vmem:[#allocation3 + $0x78] sm:$0xff]   ;;  %v1643_v4 = vld [vmem:[#allocation3 + $0x70] sm:$0xff]  }
  0x26   :  { %72 = vst [vmem:[#allocation2] sm:$0xff] %v1840_v0  ;;  %73 = vst [vmem:[#allocation2 + $0x20] sm:$0xff] %v1840_v0  ;;  %1639 = vset.pattern.permute.xlu0 %v1841_v1  ;;  %1640 = vset.pattern.permute.xlu1 %v1841_v1  ;;  %v1642_v3 = vld [vmem:[#allocation3 + $0x38] sm:$0xff]   ;;  %v1644_v5 = vld [vmem:[#allocation3 + $0x30] sm:$0xff]   ;;  %s1842_s15 = smov [#allocation9]  }
  0x27   :  { %74 = vst [vmem:[#allocation2 + $0x18] sm:$0xff] %v1840_v0  ;;  %75 = vst [vmem:[#allocation2 + $0x38] sm:$0xff] %v1840_v0  ;;  %1449 = vmatprep.subr.bf16.mxu0 %v1641_v2  ;;  %1469 = vmatprep.subr.bf16.mxu1 %v1642_v3  ;;  %v1645_v6 = vld [vmem:[#allocation3 + $0x68] sm:$0xff]   ;;  %v1647_v8 = vld [vmem:[#allocation3 + $0x60] sm:$0xff]   ;;  %s1271_s16 = sshll.u32 %s1842_s15, 4  ;;  %s1272_s16 = int_to_ptr.vmem [resolvable:$true] %s1271_s16 }
  0x28   :  { %1450 = vmatpush3.bf16.msra.mxu0 %v1641_v2  ;;  %1470 = vmatpush3.bf16.msra.mxu1 %v1642_v3  ;;  %v1646_v7 = vld [vmem:[#allocation3 + $0x28] sm:$0xff]   ;;  %v1648_v9 = vld [vmem:[#allocation3 + $0x20] sm:$0xff]   ;;  %v1649_v10 = vld [vmem:[#allocation3 + $0x58] sm:$0xff]   ;;  %p1814_p2 = scmp.lt.s32.totalorder %s1272_s16, %s1272_s16 }
  0x29   :  { %1451 = vmatprep.subr.bf16.mxu0 %v1643_v4  ;;  %1471 = vmatprep.subr.bf16.mxu1 %v1644_v5  ;;  %v1650_v11 = vld [vmem:[#allocation3 + $0x18] sm:$0xff]   ;;  %v1651_v12 = vld [vmem:[#allocation3 + $0x50] sm:$0xff]   ;;  %v76_v14 = vld [vmem:[%s2033_s0] sm:$0xff] }
  0x2a   :  { %v1652_v13 = vld [vmem:[#allocation3 + $0x10] sm:$0xff]   ;;  %v77_v15 = vld [vmem:[%s2033_s0 + $0x8] sm:$0xff]  ;;  %80 = vst [vmem:[#allocation2 + $0x8] sm:$0xff] %v76_v14  ;;  %v79_v18 = vld [vmem:[%s2033_s0 + $0x18] sm:$0xff] }
  0x2b   :  { %v78_v16 = vld [vmem:[%s2033_s0 + $0x10] sm:$0xff]  ;;  %81 = vst [vmem:[#allocation2 + $0x10] sm:$0xff] %v77_v15  ;;  %v119_v17 = vpack.c.bf16 %v77_v15, %v76_v14  ;;  %83 = vst [vmem:[#allocation2 + $0x30] sm:$0xff] %v79_v18  ;;  %v1653_v19 = vld [vmem:[#allocation3 + $0x48] sm:$0xff]  }
  0x2c   :  { %1452 = vmatpush3.bf16.msra.mxu0 %v1643_v4  ;;  %1472 = vmatpush3.bf16.msra.mxu1 %v1644_v5  ;;  %82 = vst [vmem:[#allocation2 + $0x28] sm:$0xff] %v78_v16  ;;  %v1654_v20 = vld [vmem:[#allocation3 + $0x8] sm:$0xff]   ;;  %v1655_v21 = vld [vmem:[#allocation3 + $0x40] sm:$0xff]   ;;  %v1657_v27 = vld [vmem:[#allocation3 + $0xb8] sm:$0xff]   ;;  %v120_v35 = vpack.c.bf16 %v79_v18, %v78_v16 }
  0x2d   :  { %1453 = vmatprep.subr.bf16.mxu0 %v1645_v6  ;;  %1473 = vmatprep.subr.bf16.mxu1 %v1646_v7  ;;  %v1656_v24 = vld [vmem:[#allocation3] sm:$0xff]   ;;  %v86_v32 = vld [vmem:[%s2034_s1 + $0x10] sm:$0xff]  ;;  %v85_v33 = vld [vmem:[%s2034_s1 + $0x8] sm:$0xff] }
  0x2e   :  { %1465 = vmatprep.mubr.bf16.mxu0 %v119_v17  ;;  %v84_v31 = vld [vmem:[%s2034_s1] sm:$0xff]  ;;  %vm90_vm1 = vcmp.gt.f32.partialorder %v86_v32, 0.5  ;;  %vm89_vm2 = vcmp.gt.f32.partialorder %v85_v33, 0.5  ;;  %v87_v34 = vld [vmem:[%s2034_s1 + $0x18] sm:$0xff]  ;;  %v1658_v36 = vld [vmem:[#allocation3 + $0xb0] sm:$0xff]  }
  0x2f   :  { %vm88_vm0 = vcmp.gt.f32.partialorder %v84_v31, 0.5  ;;  %v472_v38 = vsel %vm90_vm1, 1, %v1841_v1  ;;  %vm91_vm3 = vcmp.gt.f32.partialorder %v87_v34, 0.5  ;;  %v471_v40 = vsel %vm89_vm2, 1, %v1841_v1  ;;  %v1659_v43 = vld [vmem:[#allocation3 + $0xa8] sm:$0xff]   ;;  %v1660_v44 = vld [vmem:[#allocation3 + $0xa0] sm:$0xff]  }
  0x30   :  { %1454 = vmatpush3.bf16.msra.mxu0 %v1645_v6  ;;  %1474 = vmatpush3.bf16.msra.mxu1 %v1646_v7  ;;  %v470_v37 = vsel %vm88_vm0, 1, %v1841_v1  ;;  %v473_v41 = vsel %vm91_vm3, 1, %v1841_v1  ;;  %v1661_v45 = vld [vmem:[#allocation3 + $0x98] sm:$0xff]   ;;  %v1662_v46 = vld [vmem:[#allocation3 + $0x90] sm:$0xff]   ;;  %v1663_v47 = vld [vmem:[#allocation3 + $0x88] sm:$0xff]  }
  0x31   :  { %1455 = vmatprep.subr.bf16.mxu0 %v1647_v8  ;;  %1475 = vmatprep.subr.bf16.mxu1 %v1648_v9  ;;  %v93_v22 = vld [vmem:[#allocation2 + $0x7] sm:$0xff]  ;;  %v1665_v52 = vld [vmem:[#allocation6 + $0x78] sm:$0xff]   ;;  %v1667_v53 = vld [vmem:[#allocation6 + $0x70] sm:$0xff]  }
  0x32   :  { %v94_v23 = vld [vmem:[#allocation2 + $0xf] sm:$0xff]  ;;  %475 = vperm.xlu0 %1639, %v470_v37   ;;  %481 = vperm.xlu1 %1640, %v472_v38   ;;  %v1664_v48 = vld [vmem:[#allocation3 + $0x80] sm:$0xff]   ;;  %v1666_v55 = vld [vmem:[#allocation6 + $0x38] sm:$0xff]  }
  0x33   :  { %v97_v25 = vpack.c.bf16 %v94_v23, %v93_v22  ;;  %v95_v26 = vld [vmem:[#allocation2 + $0x27] sm:$0xff]  ;;  %v96_v28 = vld [vmem:[#allocation2 + $0x2f] sm:$0xff]  ;;  %v1673_v59 = vld [vmem:[#allocation6 + $0x58] sm:$0xff]  }
  0x34   :  { %1456 = vmatpush3.bf16.msra.mxu0 %v1647_v8  ;;  %1476 = vmatpush3.bf16.msra.mxu1 %v1648_v9  ;;  %v332_v29 = vld [vmem:[#allocation2 + $0x9] sm:$0xff]  ;;  %v333_v30 = vld [vmem:[#allocation2 + $0x11] sm:$0xff]  ;;  %v98_v39 = vpack.c.bf16 %v96_v28, %v95_v26  ;;  %v1671_v56 = vld [vmem:[#allocation6 + $0x60] sm:$0xff]  }
  0x35   :  { %1457 = vmatprep.subr.bf16.mxu0 %v1649_v10  ;;  %1477 = vmatprep.subr.bf16.mxu1 %v1650_v11  ;;  %v336_v42 = vpack.c.bf16 %v333_v30, %v332_v29  ;;  %v334_v49 = vld [vmem:[#allocation2 + $0x29] sm:$0xff]  ;;  %v335_v50 = vld [vmem:[#allocation2 + $0x31] sm:$0xff]  ;;  %v1672_v61 = vld [vmem:[#allocation6 + $0x20] sm:$0xff]  }
  0x36   :  { %1485 = vmatprep.mubr.bf16.mxu1 %v97_v25  ;;  %478 = vperm.xlu0 %1639, %v471_v40   ;;  %v337_v51 = vpack.c.bf16 %v335_v50, %v334_v49  ;;  %v1669_v54 = vld [vmem:[#allocation6 + $0x68] sm:$0xff]   ;;  %v1668_v57 = vld [vmem:[#allocation6 + $0x30] sm:$0xff]   ;;  %v1674_v63 = vld [vmem:[#allocation6 + $0x18] sm:$0xff]  }
  0x37   :  { %484 = vperm.xlu1 %1640, %v473_v41   ;;  %v1670_v58 = vld [vmem:[#allocation6 + $0x28] sm:$0xff]   ;;  %v1675_v60 = vld [vmem:[#allocation6 + $0x50] sm:$0xff]   ;;  %v1679_v0 = vld [vmem:[#allocation6 + $0x40] sm:$0xff]  }
  0x38   :  { %1458 = vmatpush3.bf16.msra.mxu0 %v1649_v10  ;;  %1478 = vmatpush3.bf16.msra.mxu1 %v1650_v11  ;;  %v1677_v62 = vld [vmem:[#allocation6 + $0x48] sm:$0xff]   ;;  %v1676_v1 = vld [vmem:[#allocation6 + $0x10] sm:$0xff]   ;;  %v1929_v3 = vld [vmem:[#allocation6 + $0xb8] sm:$0xff]  }
  0x39   :  { %1459 = vmatprep.subr.bf16.mxu0 %v1651_v12  ;;  %1479 = vmatprep.subr.bf16.mxu1 %v1652_v13  ;;  %v1678_v2 = vld [vmem:[#allocation6 + $0x8] sm:$0xff]   ;;  %v1680_v4 = vld [vmem:[#allocation6] sm:$0xff]  }
  0x3a   :  { %v1683_v49 = vld [vmem:[#allocation6 + $0xa8] sm:$0xff]  }
  0x3c   :  { %1460 = vmatpush3.bf16.msra.mxu0 %v1651_v12  ;;  %1480 = vmatpush3.bf16.msra.mxu1 %v1652_v13  ;;  %v1308_v13 = vld [vmem:[%s2036_s3] ss:$0 sm:$0xff] }
  0x3d   :  { %1461 = vmatprep.subr.bf16.mxu0 %v1653_v19  ;;  %1481 = vmatprep.subr.bf16.mxu1 %v1654_v20 }
  0x40   :  { %1462 = vmatpush3.bf16.msra.mxu0 %v1653_v19  ;;  %1482 = vmatpush3.bf16.msra.mxu1 %v1654_v20 }
  0x41   :  { %1463 = vmatprep.subr.bf16.mxu0 %v1655_v21  ;;  %1483 = vmatprep.subr.bf16.mxu1 %v1656_v24 }
  0x44   :  { %1464 = vmatpush3.bf16.msra.mxu0 %v1655_v21  ;;  %1484 = vmatpush3.bf16.msra.mxu1 %v1656_v24 }
  0x45   :  { %1489 = vmatprep.subr.bf16.mxu0 %v1657_v27  ;;  %1509 = vmatprep.subr.bf16.mxu1 %v1665_v52 }
  0x47   :  { %1466 = vmatmul.mubr.bf16.vlgmr.msra.gmra.mxu0 %v120_v35  ;;  %1486 = vmatmul.mubr.bf16.vlgmr.msra.gmra.mxu1 %v98_v39 }
  0x48   :  { %1490 = vmatpush3.bf16.msra.mxu0 %v1657_v27  ;;  %1505 = vmatprep.mubr.bf16.mxu0 %v336_v42  ;;  %v1682_v42 = vld [vmem:[#allocation6 + $0xb0] sm:$0xff]  }
  0x49   :  { %1491 = vmatprep.subr.bf16.mxu0 %v1658_v36  ;;  %1510 = vmatpush3.bf16.msra.mxu1 %v1665_v52 }
  0x4a   :  { %1511 = vmatprep.subr.bf16.mxu1 %v1667_v53 }
  0x4c   :  { %1492 = vmatpush3.bf16.msra.mxu0 %v1658_v36 }
  0x4d   :  { %1493 = vmatprep.subr.bf16.mxu0 %v1659_v43  ;;  %1512 = vmatpush3.bf16.msra.mxu1 %v1667_v53 }
  0x4e   :  { %1513 = vmatprep.subr.bf16.mxu1 %v1669_v54 }
  0x50   :  { %1494 = vmatpush3.bf16.msra.mxu0 %v1659_v43 }
  0x51   :  { %1495 = vmatprep.subr.bf16.mxu0 %v1660_v44  ;;  %1514 = vmatpush3.bf16.msra.mxu1 %v1669_v54 }
  0x52   :  { %1515 = vmatprep.subr.bf16.mxu1 %v1671_v56 }
  0x54   :  { %1496 = vmatpush3.bf16.msra.mxu0 %v1660_v44 }
  0x55   :  { %1497 = vmatprep.subr.bf16.mxu0 %v1661_v45  ;;  %1516 = vmatpush3.bf16.msra.mxu1 %v1671_v56 }
  0x56   :  { %1517 = vmatprep.subr.bf16.mxu1 %v1673_v59 }
  0x58   :  { %1498 = vmatpush3.bf16.msra.mxu0 %v1661_v45 }
  0x59   :  { %1499 = vmatprep.subr.bf16.mxu0 %v1662_v46  ;;  %1518 = vmatpush3.bf16.msra.mxu1 %v1673_v59  ;;  %v1684_v59 = vld [vmem:[#allocation6 + $0xa0] sm:$0xff]  }
  0x5a   :  { %1519 = vmatprep.subr.bf16.mxu1 %v1675_v60 }
  0x5c   :  { %1500 = vmatpush3.bf16.msra.mxu0 %v1662_v46  ;;  %v1709_v46 = vld [vmem:[#allocation8 + $0x98] sm:$0xff]  }
  0x5d   :  { %1501 = vmatprep.subr.bf16.mxu0 %v1663_v47  ;;  %1520 = vmatpush3.bf16.msra.mxu1 %v1675_v60  ;;  %v1685_v60 = vld [vmem:[#allocation6 + $0x98] sm:$0xff]  }
  0x5e   :  { %1521 = vmatprep.subr.bf16.mxu1 %v1677_v62 }
  0x60   :  { %1502 = vmatpush3.bf16.msra.mxu0 %v1663_v47  ;;  %v1710_v47 = vld [vmem:[#allocation8 + $0x90] sm:$0xff]  }
  0x61   :  { %1503 = vmatprep.subr.bf16.mxu0 %v1664_v48  ;;  %1522 = vmatpush3.bf16.msra.mxu1 %v1677_v62  ;;  %v1687_v62 = vld [vmem:[#allocation6 + $0x88] sm:$0xff]  }
  0x62   :  { %1523 = vmatprep.subr.bf16.mxu1 %v1679_v0 }
  0x64   :  { %1504 = vmatpush3.bf16.msra.mxu0 %v1664_v48 }
  0x65   :  { %1529 = vmatprep.subr.bf16.mxu0 %v1666_v55  ;;  %1524 = vmatpush3.bf16.msra.mxu1 %v1679_v0 }
  0x66   :  { %1549 = vmatprep.subr.bf16.mxu1 %v1929_v3 }
  0x67   :  { %1506 = vmatmul.mubr.bf16.vlgmr.msra.gmra.mxu0 %v337_v51 }
  0x68   :  { %1530 = vmatpush3.bf16.msra.mxu0 %v1666_v55 }
  0x69   :  { %1531 = vmatprep.subr.bf16.mxu0 %v1668_v57 }
  0x6c   :  { %1532 = vmatpush3.bf16.msra.mxu0 %v1668_v57 }
  0x6d   :  { %1533 = vmatprep.subr.bf16.mxu0 %v1670_v58 }
  0x70   :  { %1534 = vmatpush3.bf16.msra.mxu0 %v1670_v58 }
  0x71   :  { %1535 = vmatprep.subr.bf16.mxu0 %v1672_v61 }
  0x74   :  { %1536 = vmatpush3.bf16.msra.mxu0 %v1672_v61  ;;  %v1686_v61 = vld [vmem:[#allocation6 + $0x90] sm:$0xff]  }
  0x75   :  { %1537 = vmatprep.subr.bf16.mxu0 %v1674_v63 }
  0x78   :  { %1538 = vmatpush3.bf16.msra.mxu0 %v1674_v63  ;;  %v1688_v63 = vld [vmem:[#allocation6 + $0x80] sm:$0xff]  }
  0x79   :  { %1539 = vmatprep.subr.bf16.mxu0 %v1676_v1 }
  0x7c   :  { %1540 = vmatpush3.bf16.msra.mxu0 %v1676_v1 }
  0x7d   :  { %1541 = vmatprep.subr.bf16.mxu0 %v1678_v2 }
  0x80   :  { %1542 = vmatpush3.bf16.msra.mxu0 %v1678_v2 }
  0x81   :  { %1543 = vmatprep.subr.bf16.mxu0 %v1680_v4 }
  0x84   :  { %1544 = vmatpush3.bf16.msra.mxu0 %v1680_v4  ;;  %v1691_v4 = vld [vmem:[#allocation8 + $0x70] sm:$0xff]  }
  0xad   :  { %v1935_v30 = vpop.permute.xlu1 %481  ;;  %v1937_v31 = vpop.permute.xlu0 %475 }
  0xae   :  { %vm488_vm4 = vcmp.eq.s32.totalorder %v1935_v30, 1  ;;  %vm486_vm5 = vcmp.eq.s32.totalorder %v1937_v31, 1 }
  0xaf   :  { %vm1963_vm9 = vmneg %vm486_vm5 }
  0xb0   :  { %vm1984_vm12 = vmneg %vm488_vm4 }
  0xb1   :  { %v1948_v37 = vpop.permute.xlu0 %478 }
  0xb2   :  { %v1940_v32 = vpop.permute.xlu1 %484  ;;  %vm487_vm7 = vcmp.eq.s32.totalorder %v1948_v37, 1 }
  0xb3   :  { %vm489_vm6 = vcmp.eq.s32.totalorder %v1940_v32, 1  ;;  %vm1957_vm8 = vmneg %vm487_vm7 }
  0xb4   :  { %vm1731_vm10 = vmpackc.low %vm1957_vm8, %vm1963_vm9 }
  0xb5   :  { %vm1978_vm11 = vmneg %vm489_vm6 }
  0xb6   :  { %vm1736_vm13 = vmpackc.low %vm1978_vm11, %vm1984_vm12 }
 0x107   :  { %v1467_v5 = vpop.f32.mrf.mxu0  ;;  %v1487_v6 = vpop.f32.mrf.mxu1 }
 0x108   :  { %v326_v12 = vadd.f32 %v1487_v6, %v1467_v5  ;;  %v1693_v5 = vld [vmem:[#allocation8 + $0x68] sm:$0xff]   ;;  %v1690_v6 = vld [vmem:[#allocation8 + $0x38] sm:$0xff]  }
 0x109   :  { %v220_v7 = vpop.f32.mrf.mxu0  ;;  %v317_v8 = vpop.f32.mrf.mxu1 }
 0x10a   :  { %v318_v15 = vadd.f32 %v317_v8, %v220_v7  ;;  %v1695_v7 = vld [vmem:[#allocation8 + $0x60] sm:$0xff]   ;;  %v1692_v8 = vld [vmem:[#allocation8 + $0x30] sm:$0xff]  }
 0x10b   :  { %v1468_v9 = vpop.f32.mrf.mxu0  ;;  %v1488_v10 = vpop.f32.mrf.mxu1 }
 0x10c   :  { %v329_v19 = vadd.f32 %v1488_v10, %v1468_v9  ;;  %v1697_v9 = vld [vmem:[#allocation8 + $0x58] sm:$0xff]   ;;  %v1694_v10 = vld [vmem:[#allocation8 + $0x28] sm:$0xff]  }
 0x10d   :  { %v223_v11 = vpop.f32.mrf.mxu0  ;;  %v320_v17 = vpop.f32.mrf.mxu1 }
 0x10e   :  { %v321_v23 = vadd.f32 %v320_v17, %v223_v11  ;;  %v1699_v11 = vld [vmem:[#allocation8 + $0x50] sm:$0xff]   ;;  %v1702_v17 = vld [vmem:[#allocation8 + $0x8] sm:$0xff]  }
 0x127   :  { %v1507_v14 = vpop.f32.mrf.mxu0 }
 0x128   :  { %v454_v16 = vadd.f32 %v1507_v14, %v326_v12  ;;  %v1696_v12 = vld [vmem:[#allocation8 + $0x20] sm:$0xff]   ;;  %v1698_v14 = vld [vmem:[#allocation8 + $0x18] sm:$0xff]  }
 0x129   :  { %v437_v18 = vpop.f32.mrf.mxu0 }
 0x12a   :  { %v464_v20 = vadd.f32 %v1308_v13, %v454_v16  ;;  %v452_v21 = vadd.f32 %v437_v18, %v318_v15  ;;  %v1703_v15 = vld [vmem:[#allocation8 + $0x40] sm:$0xff]   ;;  %v1700_v16 = vld [vmem:[#allocation8 + $0x10] sm:$0xff]   ;;  %v1705_v18 = vld [vmem:[#allocation8 + $0xb8] sm:$0xff]  }
 0x12b   :  { %v1508_v22 = vpop.f32.mrf.mxu0 }
 0x12c   :  { %1713 = vtanh.f32 %v464_v20  ;;  %v462_v24 = vadd.f32 %v1308_v13, %v452_v21  ;;  %v455_v25 = vadd.f32 %v1508_v22, %v329_v19  ;;  %v1704_v19 = vld [vmem:[#allocation8] sm:$0xff]  }
 0x12d   :  { %v440_v26 = vpop.f32.mrf.mxu0 }
 0x12e   :  { %1715 = vtanh.f32 %v462_v24  ;;  %v465_v27 = vadd.f32 %v1308_v13, %v455_v25  ;;  %v453_v28 = vadd.f32 %v440_v26, %v321_v23 }
 0x130   :  { %1717 = vtanh.f32 %v465_v27  ;;  %v463_v29 = vadd.f32 %v1308_v13, %v453_v28  ;;  %v1701_v13 = vld [vmem:[#allocation8 + $0x48] sm:$0xff]   ;;  %v1333_v28 = vld [vmem:[%s2038_s5] ss:$0 sm:$0xff] }
 0x132   :  { %1719 = vtanh.f32 %v463_v29 }
 0x139   :  { %v1714_v33 = vpop.eup %1713 }
 0x13a   :  { %v492_v34 = vsel %vm488_vm4, 0.0, %v1714_v33 }
 0x13b   :  { %v1716_v35 = vpop.eup %1715  ;;  %496 = vst [vmem:[#allocation2 + $0x28] sm:$0xff] %v492_v34 }
 0x13c   :  { %v490_v36 = vsel %vm486_vm5, 0.0, %v1716_v35 }
 0x13d   :  { %v1718_v38 = vpop.eup %1717  ;;  %494 = vst [vmem:[#allocation2 + $0x8] sm:$0xff] %v490_v36 }
 0x13e   :  { %v493_v39 = vsel %vm489_vm6, 0.0, %v1718_v38  ;;  %v1737_v48 = vpack.c.bf16 %v1718_v38, %v1714_v33 }
 0x13f   :  { %v1720_v40 = vpop.eup %1719  ;;  %497 = vst [vmem:[#allocation2 + $0x30] sm:$0xff] %v493_v39 }
 0x140   :  { %v491_v41 = vsel %vm487_vm7, 0.0, %v1720_v40  ;;  %v1732_v45 = vpack.c.bf16 %v1720_v40, %v1716_v35 }
 0x141   :  { %495 = vst [vmem:[#allocation2 + $0x10] sm:$0xff] %v491_v41 }
 0x142   :  { %1733 = vmatprep.mubr.msk.bf16.mxu1 %vm1731_vm10, %v1732_v45  ;;  %v501_v56 = vld [vmem:[#allocation2 + $0x27] sm:$0xff] }
 0x143   :  { %1738 = vmatmul.mubr.msk.bf16.vlgmr.msra.gmra.mxu1 %vm1736_vm13, %v1737_v48 }
 0x144   :  { %1550 = vmatpush3.bf16.msra.mxu1 %v1929_v3  ;;  %v499_v50 = vld [vmem:[#allocation2 + $0x7] sm:$0xff]  ;;  %v1689_v3 = vld [vmem:[#allocation8 + $0x78] sm:$0xff]  }
 0x145   :  { %1551 = vmatprep.subr.bf16.mxu1 %v1682_v42  ;;  %1569 = vmatprep.subr.bf16.mxu0 %v1689_v3 }
 0x146   :  { %v502_v51 = vld [vmem:[#allocation2 + $0x2f] sm:$0xff] }
 0x147   :  { %v504_v58 = vpack.c.bf16 %v502_v51, %v501_v56  ;;  %v740_v0 = vld [vmem:[#allocation2 + $0x29] sm:$0xff]  ;;  %v741_v1 = vld [vmem:[#allocation2 + $0x31] sm:$0xff] }
 0x148   :  { %v500_v52 = vld [vmem:[#allocation2 + $0xf] sm:$0xff]  ;;  %1552 = vmatpush3.bf16.msra.mxu1 %v1682_v42  ;;  %v743_v2 = vpack.c.bf16 %v741_v1, %v740_v0 }
 0x149   :  { %v738_v53 = vld [vmem:[#allocation2 + $0x9] sm:$0xff]  ;;  %v739_v54 = vld [vmem:[#allocation2 + $0x11] sm:$0xff]  ;;  %v503_v55 = vpack.c.bf16 %v500_v52, %v499_v50  ;;  %1553 = vmatprep.subr.bf16.mxu1 %v1683_v49 }
 0x14a   :  { %v742_v57 = vpack.c.bf16 %v739_v54, %v738_v53  ;;  %v1707_v0 = vld [vmem:[#allocation8 + $0xa8] sm:$0xff]  }
 0x14b   :  { %1545 = vmatprep.mubr.bf16.mxu0 %v503_v55 }
 0x14c   :  { %1565 = vmatprep.mubr.bf16.mxu1 %v742_v57  ;;  %1546 = vmatmul.mubr.bf16.vlgmr.msra.gmra.mxu0 %v504_v58 }
 0x14d   :  { %1554 = vmatpush3.bf16.msra.mxu1 %v1683_v49  ;;  %1570 = vmatpush3.bf16.msra.mxu0 %v1689_v3 }
 0x14e   :  { %1555 = vmatprep.subr.bf16.mxu1 %v1684_v59  ;;  %1571 = vmatprep.subr.bf16.mxu0 %v1691_v4 }
 0x151   :  { %1556 = vmatpush3.bf16.msra.mxu1 %v1684_v59  ;;  %1572 = vmatpush3.bf16.msra.mxu0 %v1691_v4 }
 0x152   :  { %1557 = vmatprep.subr.bf16.mxu1 %v1685_v60  ;;  %1573 = vmatprep.subr.bf16.mxu0 %v1693_v5 }
 0x155   :  { %1558 = vmatpush3.bf16.msra.mxu1 %v1685_v60  ;;  %1574 = vmatpush3.bf16.msra.mxu0 %v1693_v5 }
 0x156   :  { %1559 = vmatprep.subr.bf16.mxu1 %v1686_v61  ;;  %1575 = vmatprep.subr.bf16.mxu0 %v1695_v7 }
 0x159   :  { %1560 = vmatpush3.bf16.msra.mxu1 %v1686_v61  ;;  %1576 = vmatpush3.bf16.msra.mxu0 %v1695_v7  ;;  %v1706_v61 = vld [vmem:[#allocation8 + $0xb0] sm:$0xff]  }
 0x15a   :  { %1561 = vmatprep.subr.bf16.mxu1 %v1687_v62  ;;  %1577 = vmatprep.subr.bf16.mxu0 %v1697_v9 }
 0x15d   :  { %1562 = vmatpush3.bf16.msra.mxu1 %v1687_v62  ;;  %1578 = vmatpush3.bf16.msra.mxu0 %v1697_v9  ;;  %v1711_v9 = vld [vmem:[#allocation8 + $0x88] sm:$0xff]  }
 0x15e   :  { %1563 = vmatprep.subr.bf16.mxu1 %v1688_v63  ;;  %1579 = vmatprep.subr.bf16.mxu0 %v1699_v11 }
 0x161   :  { %1564 = vmatpush3.bf16.msra.mxu1 %v1688_v63  ;;  %1580 = vmatpush3.bf16.msra.mxu0 %v1699_v11 }
 0x162   :  { %1589 = vmatprep.subr.bf16.mxu1 %v1690_v6  ;;  %1581 = vmatprep.subr.bf16.mxu0 %v1701_v13 }
 0x164   :  { %1566 = vmatmul.mubr.bf16.vlgmr.msra.gmra.mxu1 %v743_v2 }
 0x165   :  { %1590 = vmatpush3.bf16.msra.mxu1 %v1690_v6  ;;  %1582 = vmatpush3.bf16.msra.mxu0 %v1701_v13 }
 0x166   :  { %1591 = vmatprep.subr.bf16.mxu1 %v1692_v8  ;;  %1583 = vmatprep.subr.bf16.mxu0 %v1703_v15 }
 0x169   :  { %1592 = vmatpush3.bf16.msra.mxu1 %v1692_v8  ;;  %1584 = vmatpush3.bf16.msra.mxu0 %v1703_v15  ;;  %v1708_v8 = vld [vmem:[#allocation8 + $0xa0] sm:$0xff]  }
 0x16a   :  { %1593 = vmatprep.subr.bf16.mxu1 %v1694_v10  ;;  %1609 = vmatprep.subr.bf16.mxu0 %v1705_v18 }
 0x16d   :  { %1594 = vmatpush3.bf16.msra.mxu1 %v1694_v10  ;;  %v1712_v10 = vld [vmem:[#allocation8 + $0x80] sm:$0xff]  }
 0x16e   :  { %1595 = vmatprep.subr.bf16.mxu1 %v1696_v12 }
 0x171   :  { %1596 = vmatpush3.bf16.msra.mxu1 %v1696_v12 }
 0x172   :  { %1597 = vmatprep.subr.bf16.mxu1 %v1698_v14 }
 0x175   :  { %1598 = vmatpush3.bf16.msra.mxu1 %v1698_v14 }
 0x176   :  { %1599 = vmatprep.subr.bf16.mxu1 %v1700_v16 }
 0x179   :  { %1600 = vmatpush3.bf16.msra.mxu1 %v1700_v16 }
 0x17a   :  { %1601 = vmatprep.subr.bf16.mxu1 %v1702_v17 }
 0x17d   :  { %1602 = vmatpush3.bf16.msra.mxu1 %v1702_v17 }
 0x17e   :  { %1603 = vmatprep.subr.bf16.mxu1 %v1704_v19 }
 0x181   :  { %1604 = vmatpush3.bf16.msra.mxu1 %v1704_v19 }
 0x203   :  { %v1527_v20 = vpop.f32.mrf.mxu1 }
 0x205   :  { %v626_v22 = vpop.f32.mrf.mxu1 }
 0x207   :  { %v1528_v24 = vpop.f32.mrf.mxu1 }
 0x209   :  { %v629_v26 = vpop.f32.mrf.mxu1 }
 0x20c   :  { %v1547_v21 = vpop.f32.mrf.mxu0 }
 0x20d   :  { %v732_v27 = vadd.f32 %v1547_v21, %v1527_v20 }
 0x20e   :  { %v723_v23 = vpop.f32.mrf.mxu0 }
 0x20f   :  { %v724_v33 = vadd.f32 %v723_v23, %v626_v22  ;;  %v1358_v22 = vld [vmem:[%s2040_s7] ss:$0 sm:$0xff]  ;;  %s1809_s7 = scalar_lea.vmem %s1272_s16, 512 }
 0x210   :  { %v1548_v25 = vpop.f32.mrf.mxu0  ;;  %p1810_p1 = scmp.ne.s32.totalorder %s1272_s16, %s1809_s7  ;;  %p1815_p3 = scmp.lt.s32.totalorder %s1809_s7, %s1809_s7 }
 0x211   :  { %v735_v38 = vadd.f32 %v1548_v25, %v1528_v24 }
 0x212   :  { %v726_v35 = vpop.f32.mrf.mxu0  ;;  %p1816_p4 = por %p1815_p3, %p1814_p2 }
 0x213   :  { %v727_v42 = vadd.f32 %v726_v35, %v629_v26 }
 0x214   :  { %p1817_p5 = pnand %p1816_p4, %p1810_p1 }
 0x224   :  { %v1567_v29 = vpop.f32.mrf.mxu1 }
 0x225   :  { %v860_v34 = vadd.f32 %v1567_v29, %v732_v27 }
 0x226   :  { %v843_v36 = vpop.f32.mrf.mxu1 }
 0x227   :  { %v870_v39 = vadd.f32 %v1333_v28, %v860_v34  ;;  %v858_v40 = vadd.f32 %v843_v36, %v724_v33 }
 0x228   :  { %v1568_v41 = vpop.f32.mrf.mxu1 }
 0x229   :  { %1721 = vtanh.f32 %v870_v39  ;;  %v868_v45 = vadd.f32 %v1333_v28, %v858_v40  ;;  %v861_v48 = vadd.f32 %v1568_v41, %v735_v38 }
 0x22a   :  { %v846_v49 = vpop.f32.mrf.mxu1 }
 0x22b   :  { %1723 = vtanh.f32 %v868_v45  ;;  %v871_v50 = vadd.f32 %v1333_v28, %v861_v48  ;;  %v859_v51 = vadd.f32 %v846_v49, %v727_v42 }
 0x22d   :  { %1725 = vtanh.f32 %v871_v50  ;;  %v869_v52 = vadd.f32 %v1333_v28, %v859_v51 }
 0x22f   :  { %1727 = vtanh.f32 %v869_v52 }
 0x236   :  { %v1722_v53 = vpop.eup %1721 }
 0x237   :  { %v878_v54 = vsel %vm488_vm4, 0.0, %v1722_v53 }
 0x238   :  { %v1724_v55 = vpop.eup %1723  ;;  %882 = vst [vmem:[#allocation2 + $0x28] sm:$0xff] %v878_v54 }
 0x239   :  { %v876_v56 = vsel %vm486_vm5, 0.0, %v1724_v55 }
 0x23a   :  { %v1726_v57 = vpop.eup %1725  ;;  %880 = vst [vmem:[#allocation2 + $0x8] sm:$0xff] %v876_v56 }
 0x23b   :  { %v879_v58 = vsel %vm489_vm6, 0.0, %v1726_v57  ;;  %v1747_v63 = vpack.c.bf16 %v1726_v57, %v1722_v53 }
 0x23c   :  { %v1728_v59 = vpop.eup %1727  ;;  %883 = vst [vmem:[#allocation2 + $0x30] sm:$0xff] %v879_v58 }
 0x23d   :  { %v877_v60 = vsel %vm487_vm7, 0.0, %v1728_v59  ;;  %v1742_v62 = vpack.c.bf16 %v1728_v59, %v1724_v55 }
 0x23e   :  { %881 = vst [vmem:[#allocation2 + $0x10] sm:$0xff] %v877_v60 }
 0x23f   :  { %1743 = vmatprep.mubr.msk.bf16.mxu0 %vm1731_vm10, %v1742_v62  ;;  %v887_v6 = vld [vmem:[#allocation2 + $0x27] sm:$0xff] }
 0x240   :  { %1748 = vmatmul.mubr.msk.bf16.vlgmr.msra.gmra.mxu0 %vm1736_vm13, %v1747_v63 }
 0x241   :  { %1610 = vmatpush3.bf16.msra.mxu0 %v1705_v18  ;;  %v885_v1 = vld [vmem:[#allocation2 + $0x7] sm:$0xff] }
 0x242   :  { %1611 = vmatprep.subr.bf16.mxu0 %v1706_v61 }
 0x243   :  { %v888_v2 = vld [vmem:[#allocation2 + $0x2f] sm:$0xff] }
 0x244   :  { %v890_v7 = vpack.c.bf16 %v888_v2, %v887_v6  ;;  %v1126_v11 = vld [vmem:[#allocation2 + $0x29] sm:$0xff]  ;;  %v1127_v12 = vld [vmem:[#allocation2 + $0x31] sm:$0xff] }
 0x245   :  { %v886_v3 = vld [vmem:[#allocation2 + $0xf] sm:$0xff]  ;;  %1612 = vmatpush3.bf16.msra.mxu0 %v1706_v61  ;;  %v1129_v13 = vpack.c.bf16 %v1127_v12, %v1126_v11 }
 0x246   :  { %v1124_v4 = vld [vmem:[#allocation2 + $0x9] sm:$0xff]  ;;  %v1125_v5 = vld [vmem:[#allocation2 + $0x11] sm:$0xff]  ;;  %v889_v43 = vpack.c.bf16 %v886_v3, %v885_v1  ;;  %1613 = vmatprep.subr.bf16.mxu0 %v1707_v0 }
 0x247   :  { %v1128_v44 = vpack.c.bf16 %v1125_v5, %v1124_v4 }
 0x248   :  { %1605 = vmatprep.mubr.bf16.mxu1 %v889_v43 }
 0x249   :  { %1625 = vmatprep.mubr.bf16.mxu0 %v1128_v44  ;;  %1606 = vmatmul.mubr.bf16.vlgmr.msra.gmra.mxu1 %v890_v7 }
 0x24a   :  { %1614 = vmatpush3.bf16.msra.mxu0 %v1707_v0 }
 0x24b   :  { %1615 = vmatprep.subr.bf16.mxu0 %v1708_v8 }
 0x24e   :  { %1616 = vmatpush3.bf16.msra.mxu0 %v1708_v8 }
 0x24f   :  { %1617 = vmatprep.subr.bf16.mxu0 %v1709_v46 }
 0x252   :  { %1618 = vmatpush3.bf16.msra.mxu0 %v1709_v46 }
 0x253   :  { %1619 = vmatprep.subr.bf16.mxu0 %v1710_v47 }
 0x256   :  { %1620 = vmatpush3.bf16.msra.mxu0 %v1710_v47 }
 0x257   :  { %1621 = vmatprep.subr.bf16.mxu0 %v1711_v9 }
 0x25a   :  { %1622 = vmatpush3.bf16.msra.mxu0 %v1711_v9 }
 0x25b   :  { %1623 = vmatprep.subr.bf16.mxu0 %v1712_v10 }
 0x25e   :  { %1624 = vmatpush3.bf16.msra.mxu0 %v1712_v10 }
 0x261   :  { %1626 = vmatmul.mubr.bf16.vlgmr.msra.gmra.mxu0 %v1129_v13 }
 0x300   :  { %v1587_v14 = vpop.f32.mrf.mxu0 }
 0x302   :  { %v1012_v16 = vpop.f32.mrf.mxu0 }
 0x304   :  { %v1588_v18 = vpop.f32.mrf.mxu0 }
 0x306   :  { %v1015_v20 = vpop.f32.mrf.mxu0 }
 0x309   :  { %v1607_v15 = vpop.f32.mrf.mxu1 }
 0x30a   :  { %v1118_v21 = vadd.f32 %v1607_v15, %v1587_v14 }
 0x30b   :  { %v1109_v17 = vpop.f32.mrf.mxu1 }
 0x30c   :  { %v1110_v24 = vadd.f32 %v1109_v17, %v1012_v16 }
 0x30d   :  { %v1608_v19 = vpop.f32.mrf.mxu1 }
 0x30e   :  { %v1121_v28 = vadd.f32 %v1608_v19, %v1588_v18 }
 0x30f   :  { %v1112_v26 = vpop.f32.mrf.mxu1 }
 0x310   :  { %v1113_v35 = vadd.f32 %v1112_v26, %v1015_v20 }
 0x321   :  { %v1627_v23 = vpop.f32.mrf.mxu0 }
 0x322   :  { %v1246_v25 = vadd.f32 %v1627_v23, %v1118_v21 }
 0x323   :  { %v1229_v27 = vpop.f32.mrf.mxu0 }
 0x324   :  { %v1256_v29 = vadd.f32 %v1358_v22, %v1246_v25  ;;  %v1244_v33 = vadd.f32 %v1229_v27, %v1110_v24 }
 0x325   :  { %v1628_v34 = vpop.f32.mrf.mxu0 }
 0x326   :  { %v1260_v36 = vsel %vm488_vm4, 0.0, %v1256_v29  ;;  %v1254_v38 = vadd.f32 %v1358_v22, %v1244_v33  ;;  %v1247_v39 = vadd.f32 %v1628_v34, %v1121_v28 }
 0x327   :  { %1264 = vst [vmem:[#allocation9 + $0x10] sm:$0xff] %v1260_v36  ;;  %v1232_v40 = vpop.f32.mrf.mxu0 }
 0x328   :  { %v1258_v41 = vsel %vm486_vm5, 0.0, %v1254_v38  ;;  %v1257_v42 = vadd.f32 %v1358_v22, %v1247_v39  ;;  %v1245_v45 = vadd.f32 %v1232_v40, %v1113_v35 }
 0x329   :  { %1262 = vst [vmem:[#allocation9] sm:$0xff] %v1258_v41 }
 0x32a   :  { %v1261_v48 = vsel %vm489_vm6, 0.0, %v1257_v42  ;;  %v1255_v49 = vadd.f32 %v1358_v22, %v1245_v45 }
 0x32b   :  { %1265 = vst [vmem:[#allocation9 + $0x18] sm:$0xff] %v1261_v48 }
 0x32c   :  { %v1259_v30 = vsel %vm487_vm7, 0.0, %v1255_v49 }
 0x32d   :  { %1263 = vst [vmem:[#allocation9 + $0x8] sm:$0xff] %v1259_v30 }
 0x32e   :  { %1820 = shalt.err (!%p1817_p5)
}
 0x32f   :  { %s1843_s17 = smov 128   ;;  %s1844_s18 = smov 8  }
 0x330   :  { %1277 = dma.vmem_to_hbm [thread:$0]  %s1272_s16, 512, %s2041_s8, [#allocation5], %s1843_s17, %s1843_s17, %s1844_s18  }
 0x331   :  { %1833 = dma.done.wait [#allocation5], 512  }
 0x332   :  { %1834 = vsyncadd [#allocation5], 4294966784 }
 0x333   :  { %1281 = vsyncpa [#allocation4], 1 }
 0x334   :  { %1282 = vsyncpa [#allocation7], 1 }
 0x335   :  { %1283 = vsyncpa [#allocation5], 1 }

</bundles_post_ra>
